<compile_context>
chip_gen: v7x
topology: tpu7x:2x2x1
jax: 0.10.0
libtpu: 0.0.40
codegen_flags: <defaults>
</compile_context>

<pallas_src>
import jax
import jax.numpy as jnp
from jax.experimental import pallas as pl
from jax.experimental.pallas import tpu as pltpu

_LANE = 128
_BF16_SUBLANE = 16  # bf16 packs 16 rows per vreg sublane group


def _round_up(n, m):
    return ((n + m - 1) // m) * m


def _pad2d(arr, rows, cols):
    r, c = arr.shape
    return jnp.pad(arr, ((0, rows - r), (0, cols - c)))


def _tree_clip_kernel(pooled_ref, wcomb_ref, prompts_t_ref, out_ref):
    """Fused stand-in CLIP encoder + cosine-similarity head (one batch tile).

    pooled_ref    : [TB,  PDp]  mean-pooled patch pixels (bf16)
    wcomb_ref     : [PDp, Ep ]  composed (patch-embed @ projection) weight (bf16)
    prompts_t_ref : [Ep,  NPp]  100 * prompts^T (bf16, zero-padded, lane-dense)
    out_ref       : [TB,  NPp]  similarity logits (f32)
    """
    # Single composed encoder matmul (bf16 operands, f32 accumulation on MXU).
    feat = jnp.dot(pooled_ref[...], wcomb_ref[...],
                   preferred_element_type=jnp.float32)            # [TB, Ep] f32

    # L2 normalize in f32 (VPU mul/add, EUP rsqrt).  Tiny eps guards rsqrt(0)
    # for zero-padded batch rows (sliced away by the wrapper).
    sq = jnp.sum(feat * feat, axis=-1, keepdims=True)             # [TB, 1]
    feat = feat * jax.lax.rsqrt(jnp.maximum(sq, 1e-12))           # [TB, Ep]

    # similarity = 100 * feat @ prompts.T  (scale + transpose pre-folded;
    # bf16 operands keep the MXU in single-pass mode).
    out_ref[...] = jnp.dot(feat.astype(jnp.bfloat16), prompts_t_ref[...],
                           preferred_element_type=jnp.float32)    # [TB, NPp]


def _mean_pool_patches(x_nchw, patch_size):
    """NCHW -> per-image mean over the patch grid, flattened channel-major.

    Exact for the linear stand-in encoder (mean-pooling commutes with the
    patch-embed matmul).  XLA fuses the view-reshape + strided reduce, so no
    [B*NP, PD] patch slab is ever materialized in HBM.
    """
    B, C, H, W = x_nchw.shape
    ph = pw = patch_size
    nph, npw = H // ph, W // pw
    pooled = x_nchw.reshape(B, C, nph, ph, npw, pw).mean(axis=(2, 4))  # [B,C,ph,pw]
    return pooled.reshape(B, C * ph * pw)                              # [B, PD]


def _vmem_capacity_bytes():
    try:
        info = pltpu.get_tpu_info()
        cap = getattr(info, "vmem_capacity_bytes", None)
        if cap:
            return int(cap)
    except Exception:
        pass
    return 64 << 20  # conservative fallback (v7x-sized)


def decision_tree_clip_forward(x_nchw, w_patch, w_proj, prompts_normed,
                               patch_size, *, batch_tile=None):
    """Wrapper: fused patchify+pool (XLA) + fused Pallas similarity kernel."""
    B = x_nchw.shape[0]
    PD, DH = w_patch.shape
    DH2, E = w_proj.shape
    assert DH2 == DH
    num_prompts, E2 = prompts_normed.shape
    assert E2 == E

    # --- Pad to MXU/lane-friendly shapes; zero padding is mathematically exact.
    PDp = _round_up(PD, _LANE)
    Ep = _round_up(E, _LANE)
    NPp = _round_up(num_prompts, _LANE)

    vmem_cap = _vmem_capacity_bytes()
    if batch_tile is None:
        # Big tiles on 128 MiB parts (v5e/v6e), modest on 64 MiB (v7x).
        batch_tile = 1024 if vmem_cap >= (100 << 20) else 256

    # --- Batch tile: multiple of 16 (bf16 sublane packing); when B > 16 make
    # sure the parallel grid axis has >= 2 steps so v7x's 2 TCs both work.
    TB = min(batch_tile, _round_up(B, _BF16_SUBLANE))
    if B > _BF16_SUBLANE:
        TB = min(TB, _round_up(pl.cdiv(B, 2), _BF16_SUBLANE))
    TB = max(TB, _BF16_SUBLANE)

    # --- VMEM budget (conservative: everything double-buffered) with TB
    # back-off instead of silently clamping the limit below real usage.
    weight_bytes = PDp * Ep * 2 + Ep * NPp * 2            # bf16 resident operands

    def _tile_bytes(tb):
        return (2 * tb * PDp * 2                          # pooled tile (bf16, x2 buf)
                + 2 * tb * NPp * 4                        # out tile (f32, x2 buf)
                + 2 * weight_bytes)                       # conservative x2
    headroom = 4 << 20
    scoped_cap = min(max(vmem_cap // 2, 16 << 20), 96 << 20)
    while TB > _BF16_SUBLANE and _tile_bytes(TB) + headroom > scoped_cap:
        TB = max(_BF16_SUBLANE, _round_up(TB // 2, _BF16_SUBLANE))
    vmem_limit = int(min(max(_tile_bytes(TB) + headroom, 16 << 20), scoped_cap))

    Bp = _round_up(B, TB)
    grid = (Bp // TB,)

    # --- Host-side prep (pure XLA, fused / one-time).
    pooled = _mean_pool_patches(x_nchw, patch_size).astype(jnp.bfloat16)
    pooled = _pad2d(pooled, Bp, PDp)                               # [Bp, PDp] bf16

    # Compose the two linear layers once in f32, then a single bf16 cast.
    w_comb = jnp.dot(w_patch.astype(jnp.float32), w_proj.astype(jnp.float32),
                     preferred_element_type=jnp.float32)
    w_comb = _pad2d(w_comb.astype(jnp.bfloat16), PDp, Ep)          # [PDp, Ep] bf16

    # Pre-transpose prompts, fold the 100.0 scale, keep bf16 (single-pass MXU).
    prompts_t = _pad2d((100.0 * prompts_normed.T).astype(jnp.bfloat16), Ep, NPp)

    cost = pl.CostEstimate(
        flops=2 * Bp * (PDp * Ep + Ep * NPp) + 4 * Bp * Ep,
        transcendentals=Bp,
        bytes_accessed=(Bp * PDp * 2 + weight_bytes + Bp * NPp * 4),
    )

    out = pl.pallas_call(
        _tree_clip_kernel,
        out_shape=jax.ShapeDtypeStruct((Bp, NPp), jnp.float32),
        grid=grid,
        in_specs=[
            pl.BlockSpec((TB, PDp), lambda i: (i, 0)),    # pooled patches (tiled)
            pl.BlockSpec((PDp, Ep), lambda i: (0, 0)),    # composed weight, resident
            pl.BlockSpec((Ep, NPp), lambda i: (0, 0)),    # scaled prompts^T, resident
        ],
        out_specs=pl.BlockSpec((TB, NPp), lambda i: (i, 0)),
        compiler_params=pltpu.CompilerParams(
            dimension_semantics=("parallel",),
            vmem_limit_bytes=vmem_limit),
        cost_estimate=cost,
    )(pooled, w_comb, prompts_t)

    return out[:B, :num_prompts]


def reference_forward_f32(x_nchw, w_patch, w_proj, prompts_normed, patch_size):
    """Pure-f32 reference of the stand-in forward (embed -> pool -> project)."""
    B, C, H, W = x_nchw.shape
    ph = pw = patch_size
    nph, npw = H // ph, W // pw
    patches = x_nchw.reshape(B, C, nph, ph, npw, pw)
    patches = jnp.transpose(patches, (0, 2, 4, 1, 3, 5)).reshape(B, nph * npw, -1)
    h = patches.astype(jnp.float32) @ w_patch                     # [B, NP, DH]
    pooled = h.mean(axis=1)                                       # [B, DH]
    feat = pooled @ w_proj                                        # [B, E]
    feat = feat / jnp.linalg.norm(feat, axis=-1, keepdims=True)
    return 100.0 * feat @ prompts_normed.T


def reference_forward_mixed(x_nchw, w_patch, w_proj, prompts_normed, patch_size):
    """Reference mirroring the kernel's composed-bf16 / f32-accumulate recipe."""
    pooled = _mean_pool_patches(x_nchw, patch_size).astype(jnp.bfloat16)
    w_comb = (w_patch.astype(jnp.float32) @ w_proj.astype(jnp.float32)
              ).astype(jnp.bfloat16)
    feat = jnp.dot(pooled, w_comb, preferred_element_type=jnp.float32)
    feat = feat * jax.lax.rsqrt(
        jnp.maximum(jnp.sum(feat * feat, axis=-1, keepdims=True), 1e-12))
    prompts_t = (100.0 * prompts_normed.T).astype(jnp.bfloat16)
    return jnp.dot(feat.astype(jnp.bfloat16), prompts_t,
                   preferred_element_type=jnp.float32)


if __name__ == "__main__":
    # Small shapes consistent with the module's forward (images in NCHW).
    B, C, H, W = 2, 4, 16, 16
    PATCH = 8
    D_HIDDEN = 32          # synthetic ViT width
    EMBED = 32             # CLIP joint embedding dim (stand-in)
    NUM_PROMPTS = 2        # root node descendants: living / non-living thing

    key = jax.random.PRNGKey(0)
    kx, kwp, kwj, kpr = jax.random.split(key, 4)

    x = jax.random.normal(kx, (B, C, H, W), dtype=jnp.float32)

    PD = C * PATCH * PATCH
    w_patch = jax.random.normal(kwp, (PD, D_HIDDEN), dtype=jnp.float32) * 0.05
    w_proj = jax.random.normal(kwj, (D_HIDDEN, EMBED), dtype=jnp.float32) * 0.05

    # Synthetic "encode_text" outputs for the root node prompts, pre-normalized
    # exactly as GetDecendantsPromptsDict caches them.
    prompts = jax.random.normal(kpr, (NUM_PROMPTS, EMBED), dtype=jnp.float32)
    prompts = prompts / jnp.linalg.norm(prompts, axis=-1, keepdims=True)

    sim = decision_tree_clip_forward(x, w_patch, w_proj, prompts, PATCH)
    sim = jax.block_until_ready(sim)
    assert sim.shape == (B, NUM_PROMPTS)

    # Tight check against a reference using the same mixed-precision recipe.
    ref_mixed = reference_forward_mixed(x, w_patch, w_proj, prompts, PATCH)
    assert jnp.allclose(sim, ref_mixed, atol=5e-2, rtol=5e-2), (sim, ref_mixed)

    # Loose check against the pure-f32 original semantics (bf16 operand rounding
    # only; outputs are 100-scaled cosine similarities).
    ref_f32 = reference_forward_f32(x, w_patch, w_proj, prompts, PATCH)
    assert jnp.allclose(sim, ref_f32, atol=3.0, rtol=0.0), (sim, ref_f32)

    print("KERNEL_OK")
</pallas_src>

<mosaic_0001>
module attributes {stable_mosaic.version = 11 : i64} {
  func.func @_tree_clip_kernel(%arg0: i32, %arg1: memref<16x256xbf16, #tpu.memory_space<vmem>>, %arg2: memref<256x128xbf16, #tpu.memory_space<vmem>>, %arg3: memref<128x128xbf16, #tpu.memory_space<vmem>>, %arg4: memref<16x128xf32, #tpu.memory_space<vmem>>) attributes {dimension_semantics = [#tpu.dimension_semantics<parallel>], iteration_bounds = array<i64: 1>, scalar_prefetch = 0 : i64, scratch_operands = 0 : i64, tpu.core_type = #tpu.core_type<tc>, window_params = [{transform_indices = @transform_0, window_bounds = array<i64: 16, 256>}, {pipeline_mode = #tpu.pipeline_mode<synchronous>, transform_indices = @transform_1, window_bounds = array<i64: 256, 128>}, {pipeline_mode = #tpu.pipeline_mode<synchronous>, transform_indices = @transform_2, window_bounds = array<i64: 128, 128>}, {transform_indices = @transform_3, window_bounds = array<i64: 16, 128>}]} {
    %c0 = arith.constant 0 : index
    %c0_0 = arith.constant 0 : index
    %0 = vector.load %arg1[%c0, %c0_0] : memref<16x256xbf16, #tpu.memory_space<vmem>>, vector<16x256xbf16>
    %c0_1 = arith.constant 0 : index
    %c0_2 = arith.constant 0 : index
    %1 = vector.load %arg2[%c0_1, %c0_2] : memref<256x128xbf16, #tpu.memory_space<vmem>>, vector<256x128xbf16>
    %cst = arith.constant dense<0.000000e+00> : vector<16x128xf32>
    %2 = tpu.matmul %0, %1, %cst {dimension_numbers = #tpu.dot_dimension_numbers<[1], [0], [0], [1], [0, 0, 1, 1], [], []>} : vector<16x256xbf16>, vector<256x128xbf16>, vector<16x128xf32> -> vector<16x128xf32>
    %3 = arith.mulf %2, %2 : vector<16x128xf32>
    %cst_3 = arith.constant dense<0.000000e+00> : vector<16xf32>
    %4 = vector.multi_reduction <add>, %3, %cst_3 [1] : vector<16x128xf32> to vector<16xf32>
    %5 = vector.shape_cast %4 : vector<16xf32> to vector<16x1xf32>
    %cst_4 = arith.constant 9.99999996E-13 : f32
    %6 = vector.broadcast %cst_4 : f32 to vector<16x1xf32>
    %7 = arith.maximumf %5, %6 : vector<16x1xf32>
    %8 = math.rsqrt %7 : vector<16x1xf32>
    %9 = vector.broadcast %8 : vector<16x1xf32> to vector<16x128xf32>
    %10 = arith.mulf %2, %9 : vector<16x128xf32>
    %11 = arith.truncf %10 : vector<16x128xf32> to vector<16x128xbf16>
    %c0_5 = arith.constant 0 : index
    %c0_6 = arith.constant 0 : index
    %12 = vector.load %arg3[%c0_5, %c0_6] : memref<128x128xbf16, #tpu.memory_space<vmem>>, vector<128x128xbf16>
    %cst_7 = arith.constant dense<0.000000e+00> : vector<16x128xf32>
    %13 = tpu.matmul %11, %12, %cst_7 {dimension_numbers = #tpu.dot_dimension_numbers<[1], [0], [0], [1], [0, 0, 1, 1], [], []>} : vector<16x128xbf16>, vector<128x128xbf16>, vector<16x128xf32> -> vector<16x128xf32>
    %c0_8 = arith.constant 0 : index
    %c0_9 = arith.constant 0 : index
    %14 = vector.load %arg4[%c0_8, %c0_9] : memref<16x128xf32, #tpu.memory_space<vmem>>, vector<16x128xf32>
    tpu.vector_store %arg4[%c0_8, %c0_9], %13 {strides = array<i32>} : memref<16x128xf32, #tpu.memory_space<vmem>>, vector<16x128xf32>,
    return
  }
  func.func @transform_0(%arg0: i32) -> (i32, i32) {
    %c0_i32 = arith.constant 0 : i32
    %c0_i32_0 = arith.constant 0 : i32
    return %arg0, %c0_i32 : i32, i32
  }
  func.func @transform_1(%arg0: i32) -> (i32, i32) {
    %c0_i32 = arith.constant 0 : i32
    %c0_i32_0 = arith.constant 0 : i32
    %c0_i32_1 = arith.constant 0 : i32
    return %c0_i32, %c0_i32_0 : i32, i32
  }
  func.func @transform_2(%arg0: i32) -> (i32, i32) {
    %c0_i32 = arith.constant 0 : i32
    %c0_i32_0 = arith.constant 0 : i32
    %c0_i32_1 = arith.constant 0 : i32
    return %c0_i32, %c0_i32_0 : i32, i32
  }
  func.func @transform_3(%arg0: i32) -> (i32, i32) {
    %c0_i32 = arith.constant 0 : i32
    %c0_i32_0 = arith.constant 0 : i32
    return %arg0, %c0_i32 : i32, i32
  }
}

</mosaic_0001>

<bundles_post_ra>
// kernel: tpu_custom_call.1
= control target key start
LH: loop header
LB: loop body
LE: loop exit
PB: predicated region body
PF: predicated region fallthrough
CT: control target
= control target key end

     0   :  { %8 = vsyncpa [#allocation3], 0  ;;  %s678_s0 = inlined_call_operand.hbm [shape: bf16[16,256], index: 0, kind: input, shape index: {}]   ;;  %s679_s1 = inlined_call_operand.hbm [shape: bf16[256,128], index: 1, kind: input, shape index: {}]   ;;  %s680_s2 = inlined_call_operand.hbm [shape: bf16[128,128], index: 2, kind: input, shape index: {}]   ;;  %s681_s3 = inlined_call_operand.hbm [shape: f32[16,128], index: 3, kind: output, shape index: {}]  }
   0x1   :  { %9 = vsyncpa [#allocation6], 0 }
   0x2   :  { %10 = vsyncpa [#allocation4], 0  ;;  %s588_s12 = smov [#allocation5]   ;;  %s494_s16 = scalar_lea.hbm %s679_s1, 2048 }
   0x3   :  { %s28_s13 = sshll.u32 %s588_s12, 4  ;;  %p495_p0 = scmp.ne.s32.totalorder %s679_s1, %s494_s16  ;;  %s29_s13 = int_to_ptr.vmem [resolvable:$true] %s28_s13 }
   0x4   :  { %p498_p1 = scmp.lt.u32.totalorder %s494_s16, %s679_s1 }
   0x6   :  { %p500_p2 = pnand %p498_p1, %p495_p0 }
   0x8   :  { %503 = shalt.err (!%p500_p2)
}
   0x9   :  { %s504_s21 = scalar_lea.vmem %s29_s13, 2048  ;;  %p509_p4 = scmp.lt.s32.totalorder %s29_s13, %s29_s13 }
   0xa   :  { %p505_p3 = scmp.ne.s32.totalorder %s29_s13, %s504_s21  ;;  %p510_p5 = scmp.lt.s32.totalorder %s504_s21, %s504_s21 }
   0xc   :  { %p511_p6 = por %p510_p5, %p509_p4 }
   0xe   :  { %p512_p7 = pnand %p511_p6, %p505_p3 }
  0x10   :  { %515 = shalt.err (!%p512_p7)
}
  0x11   :  { %s589_s22 = smov 64   ;;  %s590_s23 = smov 4  }
  0x12   :  { %34 = dma.hbm_to_vmem [thread:$0]  %s679_s1, 2048, %s29_s13, [#allocation6], %s589_s22, %s589_s22, %s590_s23  }
  0x13   :  { %s591_s26 = smov [#allocation2]   ;;  %s516_s30 = scalar_lea.hbm %s678_s0, 256 }
  0x14   :  { %s16_s27 = sshll.u32 %s591_s26, 4  ;;  %p517_p8 = scmp.ne.s32.totalorder %s678_s0, %s516_s30  ;;  %s17_s27 = int_to_ptr.vmem [resolvable:$true] %s16_s27 }
  0x15   :  { %p520_p9 = scmp.lt.u32.totalorder %s516_s30, %s678_s0 }
  0x17   :  { %p522_p10 = pnand %p520_p9, %p517_p8 }
  0x19   :  { %525 = shalt.err (!%p522_p10)
}
  0x1a   :  { %s526_s8 = scalar_lea.vmem %s17_s27, 256  ;;  %p531_p12 = scmp.lt.s32.totalorder %s17_s27, %s17_s27 }
  0x1b   :  { %p527_p11 = scmp.ne.s32.totalorder %s17_s27, %s526_s8  ;;  %p532_p13 = scmp.lt.s32.totalorder %s526_s8, %s526_s8 }
  0x1d   :  { %p533_p0 = por %p532_p13, %p531_p12 }
  0x1f   :  { %p534_p1 = pnand %p533_p0, %p527_p11 }
  0x21   :  { %537 = shalt.err (!%p534_p1)
}
  0x22   :  { %s592_s1 = smov 128   ;;  %s593_s9 = smov 8  }
  0x23   :  { %22 = dma.hbm_to_vmem [thread:$0]  %s678_s0, 256, %s17_s27, [#allocation3], %s592_s1, %s592_s1, %s593_s9  }
  0x24   :  { %s594_s12 = smov [#allocation7]   ;;  %s538_s16 = scalar_lea.hbm %s680_s2, 1024 }
  0x25   :  { %s40_s13 = sshll.u32 %s594_s12, 4  ;;  %p539_p2 = scmp.ne.s32.totalorder %s680_s2, %s538_s16  ;;  %s41_s13 = int_to_ptr.vmem [resolvable:$true] %s40_s13 }
  0x26   :  { %p542_p3 = scmp.lt.u32.totalorder %s538_s16, %s680_s2 }
  0x28   :  { %p544_p4 = pnand %p542_p3, %p539_p2 }
  0x2a   :  { %547 = shalt.err (!%p544_p4)
}
  0x2b   :  { %s548_s21 = scalar_lea.vmem %s41_s13, 1024  ;;  %p553_p6 = scmp.lt.s32.totalorder %s41_s13, %s41_s13 }
  0x2c   :  { %p549_p5 = scmp.ne.s32.totalorder %s41_s13, %s548_s21  ;;  %p554_p7 = scmp.lt.s32.totalorder %s548_s21, %s548_s21 }
  0x2e   :  { %p555_p8 = por %p554_p7, %p553_p6 }
  0x30   :  { %p556_p9 = pnand %p555_p8, %p549_p5 }
  0x32   :  { %559 = shalt.err (!%p556_p9)
}
  0x33   :  { %46 = dma.hbm_to_vmem [thread:$0]  %s680_s2, 1024, %s41_s13, [#allocation6], %s589_s22, %s589_s22, %s590_s23  }
  0x34   :  { %582 = dma.done.wait [#allocation3], 256  }
  0x35   :  { %583 = vsyncadd [#allocation3], 4294967040 }
  0x36   :  { %584 = dma.done.wait [#allocation6], 3072  }
  0x37   :  { %585 = vsyncadd [#allocation6], 4294964224  ;;  %v463_v0 = vld [vmem:[#allocation5 + $0x40] sm:$0xff]   ;;  %v465_v2 = vld [vmem:[#allocation5 + $0x48] sm:$0xff]   ;;  %v595_v19 = vmov 0.0   ;;  %vm596_vm0 = vmmov 0  }
  0x38   :  { %v464_v1 = vld [vmem:[#allocation5] sm:$0xff]   ;;  %402 = vmatprep.subr.bf16.mxu0 %v463_v0  ;;  %v466_v3 = vld [vmem:[#allocation5 + $0x8] sm:$0xff]   ;;  %v467_v4 = vld [vmem:[#allocation5 + $0x50] sm:$0xff]   ;;  %433 = vmatprep.subr.bf16.mxu1 %v595_v19  ;;  %s597_s2 = smov [#allocation8]  }
  0x39   :  { %403 = vmatpush3.bf16.msra.mxu0 %v464_v1  ;;  %v468_v5 = vld [vmem:[#allocation5 + $0x10] sm:$0xff]   ;;  %v469_v6 = vld [vmem:[#allocation5 + $0x58] sm:$0xff]   ;;  %v471_v8 = vld [vmem:[#allocation5 + $0x60] sm:$0xff]   ;;  %449 = vmatprep.mubr.msk.bf16.mxu1 %vm596_vm0, %v595_v19  ;;  %s363_s22 = sshll.u32 %s597_s2, 4  ;;  %s364_s22 = int_to_ptr.vmem [resolvable:$true] %s363_s22 }
  0x3a   :  { %404 = vmatprep.subr.bf16.mxu0 %v465_v2  ;;  %v470_v7 = vld [vmem:[#allocation5 + $0x18] sm:$0xff]   ;;  %v472_v9 = vld [vmem:[#allocation5 + $0x20] sm:$0xff]   ;;  %v473_v10 = vld [vmem:[#allocation5 + $0x68] sm:$0xff]   ;;  %s560_s23 = scalar_lea.vmem %s364_s22, 256  ;;  %p565_p11 = scmp.lt.s32.totalorder %s364_s22, %s364_s22 }
  0x3b   :  { %v474_v11 = vld [vmem:[#allocation5 + $0x28] sm:$0xff]   ;;  %v481_v12 = vld [vmem:[#allocation2 + $0x4] ss:$8 sps:$4 sm:$0xff]   ;;  %v479_v17 = vld [vmem:[#allocation2] ss:$8 sps:$4 sm:$0xff]   ;;  %p561_p10 = scmp.ne.s32.totalorder %s364_s22, %s560_s23  ;;  %p566_p12 = scmp.lt.s32.totalorder %s560_s23, %s560_s23 }
  0x3c   :  { %v475_v13 = vld [vmem:[#allocation5 + $0x70] sm:$0xff]   ;;  %229 = vmatprep.mubr.bf16.mxu0 %v481_v12  ;;  %v477_v15 = vld [vmem:[#allocation5 + $0x78] sm:$0xff]   ;;  %v482_v18 = vld [vmem:[#allocation7] sm:$0xff]  }
  0x3d   :  { %405 = vmatpush3.bf16.msra.mxu0 %v466_v3  ;;  %v476_v14 = vld [vmem:[#allocation5 + $0x30] sm:$0xff]   ;;  %v478_v16 = vld [vmem:[#allocation5 + $0x38] sm:$0xff]   ;;  %434 = vmatpush3.bf16.msra.mxu1 %v482_v18  ;;  %v483_v20 = vld [vmem:[#allocation7 + $0x8] sm:$0xff]   ;;  %p567_p13 = por %p566_p12, %p565_p11 }
  0x3e   :  { %406 = vmatprep.subr.bf16.mxu0 %v467_v4  ;;  %435 = vmatprep.subr.bf16.mxu1 %v595_v19  ;;  %v484_v21 = vld [vmem:[#allocation7 + $0x10] sm:$0xff]   ;;  %v485_v30 = vld [vmem:[#allocation7 + $0x18] sm:$0xff]   ;;  %v486_v31 = vld [vmem:[#allocation7 + $0x20] sm:$0xff]  }
  0x3f   :  { %v487_v32 = vld [vmem:[#allocation7 + $0x28] sm:$0xff]   ;;  %v488_v33 = vld [vmem:[#allocation7 + $0x30] sm:$0xff]   ;;  %v489_v34 = vld [vmem:[#allocation7 + $0x38] sm:$0xff]   ;;  %p568_p0 = pnand %p567_p13, %p561_p10 }
  0x41   :  { %407 = vmatpush3.bf16.msra.mxu0 %v468_v5  ;;  %436 = vmatpush3.bf16.msra.mxu1 %v483_v20 }
  0x42   :  { %408 = vmatprep.subr.bf16.mxu0 %v469_v6  ;;  %437 = vmatprep.subr.bf16.mxu1 %v595_v19 }
  0x45   :  { %409 = vmatpush3.bf16.msra.mxu0 %v470_v7  ;;  %438 = vmatpush3.bf16.msra.mxu1 %v484_v21 }
  0x46   :  { %410 = vmatprep.subr.bf16.mxu0 %v471_v8  ;;  %439 = vmatprep.subr.bf16.mxu1 %v595_v19 }
  0x49   :  { %411 = vmatpush3.bf16.msra.mxu0 %v472_v9  ;;  %440 = vmatpush3.bf16.msra.mxu1 %v485_v30 }
  0x4a   :  { %412 = vmatprep.subr.bf16.mxu0 %v473_v10  ;;  %441 = vmatprep.subr.bf16.mxu1 %v595_v19 }
  0x4d   :  { %413 = vmatpush3.bf16.msra.mxu0 %v474_v11  ;;  %442 = vmatpush3.bf16.msra.mxu1 %v486_v31 }
  0x4e   :  { %414 = vmatprep.subr.bf16.mxu0 %v475_v13  ;;  %443 = vmatprep.subr.bf16.mxu1 %v595_v19 }
  0x51   :  { %415 = vmatpush3.bf16.msra.mxu0 %v476_v14  ;;  %444 = vmatpush3.bf16.msra.mxu1 %v487_v32 }
  0x52   :  { %416 = vmatprep.subr.bf16.mxu0 %v477_v15  ;;  %445 = vmatprep.subr.bf16.mxu1 %v595_v19 }
  0x55   :  { %417 = vmatpush3.bf16.msra.mxu0 %v478_v16  ;;  %446 = vmatpush3.bf16.msra.mxu1 %v488_v33 }
  0x56   :  { %447 = vmatprep.subr.bf16.mxu1 %v595_v19 }
  0x58   :  { %230 = vmatmul.mubr.bf16.vlgmr.msra.gmra.mrb[0].mxu0 %v479_v17 }
  0x59   :  { %448 = vmatpush3.bf16.msra.mxu1 %v489_v34 }
 0x12b   :  { %v418_v22 = vpop.f32.mrb[0].mxu0 }
 0x12c   :  { %v419_v23 = vpop.f32.mrb[1].mxu0 }
 0x12d   :  { %v420_v24 = vadd.f32 %v419_v23, %v418_v22  ;;  %v421_v25 = vpop.f32.mrb[2].mxu0 }
 0x12e   :  { %v422_v26 = vpop.f32.mrb[3].mxu0 }
 0x12f   :  { %v423_v27 = vadd.f32 %v422_v26, %v421_v25  ;;  %v238_v28 = vmul.f32 %v420_v24, %v420_v24 }
 0x131   :  { %240 = vadd.xlane.f32.xlu0 %v238_v28  ;;  %v239_v29 = vmul.f32 %v423_v27, %v423_v27 }
 0x135   :  { %242 = vadd.xlane.f32.xlu0 %v239_v29 }
 0x1be   :  { %v241_v35 = vpop.xlane.xlu0 %240 }
 0x1bf   :  { %v244_v36 = vmax.f32 %v241_v35, 1e-12 }
 0x1c1   :  { %490 = vrsqrt.f32 %v244_v36 }
 0x1c2   :  { %v243_v37 = vpop.xlane.xlu0 %242 }
 0x1c3   :  { %v245_v38 = vmax.f32 %v243_v37, 1e-12 }
 0x1c5   :  { %492 = vrsqrt.f32 %v245_v38 }
 0x1cb   :  { %v491_v39 = vpop.eup %490 }
 0x1cc   :  { %v248_v41 = vmul.f32 %v491_v39, %v420_v24 }
 0x1cf   :  { %v493_v40 = vpop.eup %492 }
 0x1d0   :  { %v249_v42 = vmul.f32 %v493_v40, %v423_v27 }
 0x1d2   :  { %v250_v43 = vpack.c.bf16 %v249_v42, %v248_v41 }
 0x1d4   :  { %450 = vmatmul.mubr.bf16.vlgmr.msra.gmra.mrb[0].mxu1 %v250_v43 }
 0x2a7   :  { %v349_v44 = vpop.f32.mrb[0].mxu1 }
 0x2a8   :  { %356 = vst [vmem:[#allocation8] sm:$0xff] %v349_v44  ;;  %v451_v45 = vpop.f32.mrb[1].mxu1 }
 0x2a9   :  { %v352_v46 = vpop.f32.mrb[2].mxu1 }
 0x2aa   :  { %357 = vst [vmem:[#allocation8 + $0x8] sm:$0xff] %v352_v46  ;;  %v452_v47 = vpop.f32.mrb[3].mxu1 }
 0x2ab   :  { %571 = shalt.err (!%p568_p0)
}
 0x2ac   :  { %s572_s27 = scalar_lea.hbm %s681_s3, 256 }
 0x2ad   :  { %p573_p1 = scmp.ne.s32.totalorder %s681_s3, %s572_s27  ;;  %p576_p2 = scmp.lt.u32.totalorder %s572_s27, %s681_s3 }
 0x2af   :  { %p578_p3 = pnand %p576_p2, %p573_p1 }
 0x2b1   :  { %581 = shalt.err (!%p578_p3)
}
 0x2b2   :  { %369 = dma.vmem_to_hbm [thread:$0]  %s364_s22, 256, %s681_s3, [#allocation4], %s592_s1, %s592_s1, %s593_s9  }
 0x2b3   :  { %586 = dma.done.wait [#allocation4], 256  }
 0x2b4   :  { %587 = vsyncadd [#allocation4], 4294967040 }
 0x2b5   :  { %373 = vsyncpa [#allocation3], 1 }
 0x2b6   :  { %374 = vsyncpa [#allocation6], 1 }
 0x2b7   :  { %375 = vsyncpa [#allocation4], 1 }

</bundles_post_ra>
